<compile_context>
chip_gen: v7x
topology: tpu7x:2x2x1
jax: 0.10.0
libtpu: 0.0.40
codegen_flags: <defaults>
</compile_context>

<pallas_src>
import functools

import numpy as np
import jax
import jax.numpy as jnp
from jax.experimental import pallas as pl
from jax.experimental.pallas import tpu as pltpu


NUM_TRANSFORMS = 3  # the synthetic `transforms` list: [invert, darken, gamma2]

_LANE_CANDIDATES = (512, 256, 128)   # lane-dense widths (multiples of 128)
_MAX_BLOCK_ROWS = 2048               # 2048 x 512 f32 = 4 MiB per buffer
_MIN_GRID_TILES = 4                  # >= 2 tiles per TensorCore on v7x
_SMALL_IMAGE_BYTES = 1 << 20         # below this, XLA fusion beats a kernel launch
_SUBLANE_FOR_ITEMSIZE = {4: 8, 2: 16, 1: 32}
_VMEM_LIMIT_BYTES = 32 * 1024 * 1024


# ----------------------------------------------------------------------------
# Transform bodies (shared between the kernel and the jnp reference/fallback).
# ----------------------------------------------------------------------------
def _apply_one(x, idx):
    if idx == 0:
        return 1.0 - x        # transforms[0]: invert
    elif idx == 1:
        return 0.5 * x        # transforms[1]: darken (brightness * 0.5)
    else:
        return x * x          # transforms[2]: gamma correction (gamma = 2)


def _fused_jnp(x, idx_seq):
    for idx in idx_seq:
        x = _apply_one(x, int(idx))
    return x


def _make_fused_kernel(idx_seq):
    """Kernel applying transforms[idx] for idx in idx_seq, fused.

    idx_seq is a tuple of concrete Python ints (the host-side random choice),
    so only the selected elementwise ops are emitted: no branches, no select
    trees, single read + single write of each tile."""

    def kernel(x_ref, o_ref):
        x = x_ref[...]
        for idx in idx_seq:
            x = _apply_one(x, idx)
        o_ref[...] = x.astype(o_ref.dtype)

    return kernel


# ----------------------------------------------------------------------------
# Cached, specialized pallas_call builder.
# ----------------------------------------------------------------------------
def _choose_block_rows(rows, sublane):
    """Largest sublane-multiple block (<= _MAX_BLOCK_ROWS rows) keeping the
    grid at >= _MIN_GRID_TILES tiles so both v7x TensorCores stay busy."""
    per_tile = (rows // _MIN_GRID_TILES) // sublane * sublane
    per_tile = max(sublane, per_tile)
    return int(min(_MAX_BLOCK_ROWS, per_tile))


@functools.lru_cache(maxsize=None)
def _build_pallas_fn(idx_seq, rows, lanes, block_rows, dtype_name):
    dtype = jnp.dtype(dtype_name)
    grid = (rows + block_rows - 1) // block_rows  # last block masked if ragged
    return pl.pallas_call(
        _make_fused_kernel(idx_seq),
        out_shape=jax.ShapeDtypeStruct((rows, lanes), dtype),
        grid=(grid,),
        in_specs=[pl.BlockSpec((block_rows, lanes), lambda i: (i, 0))],
        out_specs=pl.BlockSpec((block_rows, lanes), lambda i: (i, 0)),
        compiler_params=pltpu.CompilerParams(
            dimension_semantics=("parallel",),   # independent tiles -> megacore
            vmem_limit_bytes=_VMEM_LIMIT_BYTES,
        ),
    )


def _run_kernel_2d(x2d, idx_seq):
    rows, lanes = x2d.shape
    sublane = _SUBLANE_FOR_ITEMSIZE.get(jnp.dtype(x2d.dtype).itemsize, 8)
    block_rows = _choose_block_rows(rows, sublane)
    fn = _build_pallas_fn(idx_seq, rows, lanes, block_rows,
                          jnp.dtype(x2d.dtype).name)
    return fn(x2d)


def _apply_transform_sequence(x, idx_seq, *, small_bytes=_SMALL_IMAGE_BYTES):
    """Apply the fused transform sequence to an image of any shape."""
    idx_seq = tuple(int(i) for i in idx_seq)
    if not idx_seq:
        return x

    # TODO(synk): integer (e.g. uint8) images would need dedicated integer
    # transform bodies; the synthetic ops assume a normalized float image.
    assert jnp.issubdtype(x.dtype, jnp.floating), "expected a float image"

    orig_shape = x.shape
    n_elems = int(np.prod(orig_shape))
    itemsize = jnp.dtype(x.dtype).itemsize

    # Small-image fast path: XLA fuses 1-3 elementwise ops into one fusion;
    # the kernel launch + layout plumbing would only add overhead here.
    if n_elems * itemsize < small_bytes:
        return _fused_jnp(x, idx_seq)

    flat = x.reshape(-1)  # contiguous reshape: no HBM copy

    # Preferred zero-copy path: a lane-dense (rows, lanes) view that exactly
    # covers the image (no pad, no trailing slice).  A ragged last row-block
    # (rows % block_rows != 0) is handled by Pallas boundary masking.
    for lanes in _LANE_CANDIDATES:
        if n_elems % lanes == 0:
            rows = n_elems // lanes
            out2d = _run_kernel_2d(flat.reshape(rows, lanes), idx_seq)
            return out2d.reshape(orig_shape)

    # Fallback (element count not a multiple of 128): kernel on the largest
    # whole-row slab, tiny (< 512 element) tail finished with jnp.  No
    # full-array pad; only the final concatenate re-touches the output.
    lanes = _LANE_CANDIDATES[0]
    main_rows = n_elems // lanes
    main_elems = main_rows * lanes
    out_main = _run_kernel_2d(flat[:main_elems].reshape(main_rows, lanes), idx_seq)
    out_tail = _fused_jnp(flat[main_elems:], idx_seq)
    return jnp.concatenate([out_main.reshape(-1), out_tail]).reshape(orig_shape)


# ----------------------------------------------------------------------------
# RandomChoice.forward
# ----------------------------------------------------------------------------
def random_choice_forward(x, key, p=0.5, n=1, p_choice=None):
    """JAX/Pallas equivalent of RandomChoice.forward.

    Randomness mirrors `np.random.uniform() < p` and
    `np.random.choice(transforms, size=n, p=p_choice)` but uses jax.random
    (deterministic given `key`).  As in the PyTorch module, the decisions are
    made eagerly on the host; the kernel is specialized to them."""
    if p_choice is not None:
        p_choice = np.asarray(p_choice, dtype=np.float64)
        assert p_choice.min() >= 0 and len(p_choice) == NUM_TRANSFORMS
        p_choice = p_choice / p_choice.sum()
        p_choice_j = jnp.asarray(p_choice, dtype=jnp.float32)
    else:
        p_choice_j = None

    k_apply, k_choice = jax.random.split(key)
    apply_flag = bool(jax.random.uniform(k_apply, ()) < p)

    if not apply_flag:
        # Host-side short-circuit: no kernel launch, no HBM round trip.
        return x, apply_flag, np.zeros((0,), dtype=np.int32)

    idxs = np.asarray(
        jax.random.choice(k_choice, NUM_TRANSFORMS, shape=(n,), p=p_choice_j)
    ).astype(np.int32)

    # All n selected transforms fused into ONE pallas_call (or the small-image
    # jnp fast path).
    x = _apply_transform_sequence(x, idxs)
    return x, apply_flag, idxs


# ----------------------------------------------------------------------------
# Self-test
# ----------------------------------------------------------------------------
if __name__ == "__main__":
    key = jax.random.PRNGKey(0)
    k_small, k_rand, k_a, k_b, k_c = jax.random.split(key, 5)

    # 1) Module-sized small image (C,H,W)=(4,16,16), p=1.0: forward semantics
    #    exercised; small-image fast path (no kernel launch by design).
    x = jax.random.uniform(k_small, (4, 16, 16), dtype=jnp.float32)
    out, applied, idxs = random_choice_forward(
        x, k_rand, p=1.0, n=2, p_choice=[1.0, 2.0, 3.0])
    out = jax.block_until_ready(out)
    assert applied
    np.testing.assert_allclose(
        np.asarray(out),
        np.asarray(_fused_jnp(x, tuple(int(i) for i in idxs))),
        rtol=1e-6, atol=1e-6)

    # 2) p=0.0: host-side short-circuit, image untouched.
    out_id, applied_id, _ = random_choice_forward(x, k_rand, p=0.0, n=1)
    assert not applied_id
    np.testing.assert_allclose(np.asarray(out_id), np.asarray(x), rtol=0, atol=0)

    # 3) Kernel path, zero-copy lane-dense layout with a ragged last row-block
    #    (990 rows, block_rows=240 -> 5 grid steps, last one boundary-masked).
    x1 = jax.random.uniform(k_a, (3, 330, 512), dtype=jnp.float32)
    seq1 = (0, 2, 1)
    o1 = jax.block_until_ready(_apply_transform_sequence(x1, seq1))
    np.testing.assert_allclose(np.asarray(o1), np.asarray(_fused_jnp(x1, seq1)),
                               rtol=1e-6, atol=1e-6)

    # 4) Kernel path, element count not a multiple of 128: whole-row slab
    #    through the kernel + small jnp tail (no full-array pad).
    x2 = jax.random.uniform(k_b, (3, 300, 500), dtype=jnp.float32)
    seq2 = (2, 0)
    o2 = jax.block_until_ready(_apply_transform_sequence(x2, seq2))
    np.testing.assert_allclose(np.asarray(o2), np.asarray(_fused_jnp(x2, seq2)),
                               rtol=1e-6, atol=1e-6)

    # 5) bf16 image: dtype-aware sublane rounding (block_rows multiple of 16).
    x3 = jax.random.uniform(k_c, (4, 480, 512), dtype=jnp.float32).astype(jnp.bfloat16)
    seq3 = (1, 2)
    o3 = jax.block_until_ready(_apply_transform_sequence(x3, seq3))
    np.testing.assert_allclose(
        np.asarray(o3.astype(jnp.float32)),
        np.asarray(_fused_jnp(x3, seq3).astype(jnp.float32)),
        rtol=2e-2, atol=2e-2)

    print("KERNEL_OK")
</pallas_src>

<mosaic_0001>
module attributes {stable_mosaic.version = 11 : i64} {
  func.func @kernel(%arg0: i32, %arg1: memref<240x512xf32, #tpu.memory_space<vmem>>, %arg2: memref<240x512xf32, #tpu.memory_space<vmem>>) attributes {dimension_semantics = [#tpu.dimension_semantics<parallel>], iteration_bounds = array<i64: 5>, scalar_prefetch = 0 : i64, scratch_operands = 0 : i64, tpu.core_type = #tpu.core_type<tc>, window_params = [{transform_indices = @transform_0, window_bounds = array<i64: 240, 512>}, {transform_indices = @transform_1, window_bounds = array<i64: 240, 512>}]} {
    %c0 = arith.constant 0 : index
    %c0_0 = arith.constant 0 : index
    %0 = vector.load %arg1[%c0, %c0_0] : memref<240x512xf32, #tpu.memory_space<vmem>>, vector<240x512xf32>
    %cst = arith.constant 1.000000e+00 : f32
    %1 = vector.broadcast %cst : f32 to vector<240x512xf32>
    %2 = arith.subf %1, %0 : vector<240x512xf32>
    %3 = arith.mulf %2, %2 : vector<240x512xf32>
    %cst_1 = arith.constant 5.000000e-01 : f32
    %4 = vector.broadcast %cst_1 : f32 to vector<240x512xf32>
    %5 = arith.mulf %4, %3 : vector<240x512xf32>
    %c0_2 = arith.constant 0 : index
    %c0_3 = arith.constant 0 : index
    %6 = vector.load %arg2[%c0_2, %c0_3] : memref<240x512xf32, #tpu.memory_space<vmem>>, vector<240x512xf32>
    tpu.vector_store %arg2[%c0_2, %c0_3], %5 {strides = array<i32>} : memref<240x512xf32, #tpu.memory_space<vmem>>, vector<240x512xf32>,
    return
  }
  func.func @transform_0(%arg0: i32) -> (i32, i32) {
    %c0_i32 = arith.constant 0 : i32
    %c0_i32_0 = arith.constant 0 : i32
    return %arg0, %c0_i32 : i32, i32
  }
  func.func @transform_1(%arg0: i32) -> (i32, i32) {
    %c0_i32 = arith.constant 0 : i32
    %c0_i32_0 = arith.constant 0 : i32
    return %arg0, %c0_i32 : i32, i32
  }
}

</mosaic_0001>

<bundles_post_ra>
// kernel: tpu_custom_call.1
= control target key start
LH: loop header
LB: loop body
LE: loop exit
PB: predicated region body
PF: predicated region fallthrough
CT: control target
= control target key end

     0   :  { %6 = vsyncpa [#allocation3], 0  ;;  %s1451_s0 = inlined_call_operand.hbm [shape: f32[990,512], index: 0, kind: input, shape index: {}]   ;;  %s1452_s1 = inlined_call_operand.hbm [shape: f32[990,512], index: 1, kind: output, shape index: {}]  }
   0x1   :  { %8 = vsyncpa [#allocation3 + $0x1], 0 }
   0x2   :  { %9 = vsyncpa [#allocation4], 0 }
   0x3   :  { %11 = vsyncpa [#allocation4 + $0x1], 0  ;;  %s1035_s6 = smov 0   ;;  %s1037_s7 = smov 0  }
   0x4   :  { %s1039_s8 = smov 0   ;;  %s1041_s9 = smov 0  }
   0x5 LB: > { %s1056_s10 = sadd.s32 4294967295, %s1017_s9   ;;  %s850_s11 = sadd.s32 4294967294, %s1017_s9   ;;  %s1017_s9 = sphi %s1041_s9, %s1460_s9   ;;  %s1013_s8 = sphi %s1039_s8, %s1459_s8   ;;  %s1009_s7 = sphi %s1037_s7, %s1458_s7   ;;  %s1005_s6 = sphi %s1035_s6, %s1457_s6  }
   0x6   : > { %s1060_s12 = sadd.s32 1, %s1017_s9   ;;  %s24_s13 = sadd.s32 1, %s1013_s8 }
   0x7   : > { %s21_s14 = ssub.s32 %s1017_s9, %s1060_s12  ;;  %p31_p0 = scmp.ne.s32.totalorder %s1013_s8, %s1009_s7 }
   0x8   : > { %p22_p1 = scmp.eq.s32.totalorder %s21_s14, 0  ;;  %p32_p2 = scmp.eq.s32.totalorder %s1017_s9, 0 }
   0x9   : > { %p37_p3 = scmp.ne.s32.totalorder %s1009_s7, %s1005_s6  ;;  %p38_p4 = scmp.eq.s32.totalorder %s1056_s10, 0 }
   0xa   : > { %s1072_s15 = scalar_select %p22_p1, %s1013_s8, %s24_s13  }
   0xb   : > { %p33_p5 = por %p32_p2, %p31_p0  ;;  %p1074_p6 = por %p38_p4, %p37_p3 }
   0xc   : > { %p61_p7 = scmp.eq.s32.totalorder %s1056_s10, 4  ;;  %p67_p8 = scmp.eq.s32.totalorder %s850_s11, 4 }
   0xd   : > { %p852_p11 = scmp.ge.s32.totalorder %s1017_s9, 5 }
   0xe   : > { %p1079_p9 = por %p61_p7, %p31_p0  ;;  %p1083_p10 = por %p67_p8, %p37_p3 }
   0xf   : > { %83 = sbr.rel (%p852_p11) target bundleno = 57 (0x39), region = 16 }
  0x10   : > { %s1455_s18 = scalar_select %p1083_p10, 1, 0 }
  0x16   : > { %86 = sbr.rel (!%p33_p5) target bundleno = 57 (0x39), region = 20  ;;  %s87_s19 = sand.u32 (%p33_p5), 1, %s1013_s8  }
  0x17   : > { %s92_s20 = smul.u32 (%p33_p5), 30, %s1017_s9  ;;  %s1093_s25 = scalar_lea.sflag (%p33_p5), [#allocation3], %s87_s19 }
  0x18   : > { %s878_s21 = smul.u32 (%p33_p5), 960, %s87_s19 }
  0x19   : > { %s93_s22 = ssub.s32 (%p33_p5), 124, %s92_s20 }
  0x1a   : > { %p94_p12 = scmp.lt.s32.totalorder (%p33_p5), %s93_s22, 30  ;;  %s91_s26 = scalar_lea.vmem (%p33_p5), [#allocation2], %s878_s21 }
  0x1d   : > { %s1462_s22 = smov (!%p94_p12, %s93_s22), 30 }
  0x1e   : > { %s1090_s23 = sshll.u32 %s1462_s22, 9 }
  0x1f   : > { %s99_s24 = ssub.s32 15360, %s1090_s23 }
  0x20   : > { %100 = vsyncadd %s1093_s25, %s99_s24  ;;  %p855_p13 = scmp.ne.s32.totalorder %s1090_s23, 0  ;;  %s876_s27 = smul.u32 15360, %s1017_s9 }
  0x21   : > { %s106_s28 = sshll.u32 %s91_s26, 4  ;;  %s927_s11 = scalar_lea.hbm %s1451_s0, 63488  ;;  %s1103_s28 = int_to_ptr.vmem [resolvable:$true] %s106_s28 }
  0x22   : > { %s1101_s2 = scalar_lea.hbm %s1451_s0, %s876_s27 }
  0x23   : > { %s923_s3 = scalar_lea.hbm %s1101_s2, %s1090_s23  ;;  %p928_p3 = scmp.lt.u32.totalorder %s1101_s2, %s1451_s0 }
  0x24   : > { %p924_p0 = scmp.ne.s32.totalorder %s1101_s2, %s923_s3  ;;  %p929_p4 = scmp.lt.u32.totalorder %s927_s11, %s923_s3 }
  0x25   : > { %p931_p7 = scmp.lt.u32.totalorder %s923_s3, %s1101_s2 }
  0x26   : > { %p925_p1 = pnand %p924_p0, %p855_p13  ;;  %p930_p5 = por %p929_p4, %p928_p3 }
  0x28   : > { %p926_p2 = pneg %p925_p1  ;;  %p932_p8 = por %p931_p7, %p930_p5 }
  0x2a   : > { %p933_p11 = pnand %p932_p8, %p926_p2 }
  0x2c   : > { %936 = shalt.err (!%p933_p11)
}
  0x2d   : > { %s937_s19 = scalar_lea.vmem %s1103_s28, %s1090_s23  ;;  %s1019_s20 = smov [#allocation2]  }
  0x2e   : > { %p938_p12 = scmp.ne.s32.totalorder %s1103_s28, %s937_s19  ;;  %s941_s21 = sshll.u32 %s1019_s20, 4  ;;  %s942_s21 = int_to_ptr.vmem [resolvable:$false] %s941_s21 }
  0x2f   : > { %s943_s22 = scalar_lea.vmem %s942_s21, 30720  ;;  %p944_p10 = scmp.lt.s32.totalorder %s1103_s28, %s942_s21 }
  0x30   : > { %p939_p0 = pnand %p938_p12, %p855_p13  ;;  %p945_p3 = scmp.lt.s32.totalorder %s943_s22, %s937_s19 }
  0x32   : > { %p940_p1 = pneg %p939_p0  ;;  %p946_p4 = por %p945_p3, %p944_p10 }
  0x34   : > { %p947_p5 = pnand %p946_p4, %p940_p1 }
  0x36   : > { %950 = shalt.err (!%p947_p5)
}
  0x37   : > { %s1020_s24 = smov 512   ;;  %s1021_s26 = smov 32  }
  0x38   : > { %112 = dma.hbm_to_vmem [thread:$0]  (%p855_p13), %s1101_s2, %s1090_s23, %s1103_s28, %s1093_s25, %s1020_s24, %s1020_s24, %s1021_s26  }
  0x39 PF: > { %p860_p2 = scmp.ge.s32.totalorder %s1017_s9, 1  ;;  %p114_p7 = scmp.lt.s32.totalorder %s1017_s9, 6 }
  0x3b   : > { %p115_p8 = pnand %p860_p2, %p114_p7 }
  0x3c   : > { %s1133_s27 = sand.u32 (!%p115_p8), 1, %s1009_s7  }
  0x3d   : > { %118 = sbr.rel (%p115_p8) target bundleno = 192 (0xc0), region = 24  ;;  %s121_s30 = scalar_lea.sflag (!%p115_p8), [#allocation3], %s1133_s27 }
  0x3e   : > { %s879_s29 = smul.u32 (!%p115_p8), 960, %s1133_s27 }
  0x40   : > { %s1139_s3 = scalar_lea.vmem (!%p115_p8), [#allocation2], %s879_s29 }
  0x44   : > { %996 = dma.done.wait (%p1074_p6), %s121_s30, 15360  }
  0x45   : > { %998 = vsyncadd (%p1074_p6), %s121_s30, 4294951936  ;;  %v155_v0 = vld [vmem:[%s1139_s3] sm:$0xff]  ;;  %v156_v1 = vld [vmem:[%s1139_s3 + $0x8] sm:$0xff]  ;;  %s1162_s16 = scalar_lea.vmem [#allocation5], %s879_s29  ;;  %s756_s23 = scalar_lea.sflag [#allocation4], %s1133_s27 }
  0x46   : > { %v157_v2 = vld [vmem:[%s1139_s3 + $0x10] sm:$0xff]  ;;  %v275_v3 = vsub.f32 1.0, %v155_v0  ;;  %v276_v4 = vsub.f32 1.0, %v156_v1  ;;  %v158_v6 = vld [vmem:[%s1139_s3 + $0x18] sm:$0xff]  ;;  %v159_v7 = vld [vmem:[%s1139_s3 + $0x20] sm:$0xff]  ;;  %s763_s25 = smul.u32 (%p1079_p9), 30, %s1056_s10 }
  0x47   : > { %v277_v5 = vsub.f32 1.0, %v157_v2  ;;  %v160_v8 = vld [vmem:[%s1139_s3 + $0x28] sm:$0xff]  ;;  %v278_v9 = vsub.f32 1.0, %v158_v6  ;;  %v279_v10 = vsub.f32 1.0, %v159_v7  ;;  %v161_v12 = vld [vmem:[%s1139_s3 + $0x30] sm:$0xff]  ;;  %v162_v13 = vld [vmem:[%s1139_s3 + $0x38] sm:$0xff] }
  0x48   : > { %v280_v11 = vsub.f32 1.0, %v160_v8  ;;  %v395_v14 = vmul.f32 %v275_v3, %v275_v3  ;;  %v396_v15 = vmul.f32 %v276_v4, %v276_v4  ;;  %v281_v17 = vsub.f32 1.0, %v161_v12  ;;  %v163_v22 = vld [vmem:[%s1139_s3 + $0x40] sm:$0xff]  ;;  %v164_v23 = vld [vmem:[%s1139_s3 + $0x48] sm:$0xff]  ;;  %v165_v24 = vld [vmem:[%s1139_s3 + $0x50] sm:$0xff]  ;;  %s764_s28 = ssub.s32 (%p1079_p9), 124, %s763_s25 }
  0x49   : > { %v397_v16 = vmul.f32 %v277_v5, %v277_v5  ;;  %v398_v18 = vmul.f32 %v278_v9, %v278_v9  ;;  %v399_v19 = vmul.f32 %v279_v10, %v279_v10  ;;  %v282_v21 = vsub.f32 1.0, %v162_v13  ;;  %v166_v29 = vld [vmem:[%s1139_s3 + $0x58] sm:$0xff]  ;;  %v167_v30 = vld [vmem:[%s1139_s3 + $0x60] sm:$0xff]  ;;  %v168_v31 = vld [vmem:[%s1139_s3 + $0x68] sm:$0xff]  ;;  %p765_p6 = scmp.lt.s32.totalorder (%p1079_p9), %s764_s28, 30 }
  0x4a   : > { %v400_v20 = vmul.f32 %v280_v11, %v280_v11  ;;  %v515_v25 = vmul.f32 0.5, %v395_v14  ;;  %v516_v26 = vmul.f32 0.5, %v396_v15  ;;  %v401_v28 = vmul.f32 %v281_v17, %v281_v17  ;;  %v169_v36 = vld [vmem:[%s1139_s3 + $0x70] sm:$0xff]  ;;  %v170_v41 = vld [vmem:[%s1139_s3 + $0x78] sm:$0xff]  ;;  %v171_v54 = vld [vmem:[%s1139_s3 + $0x80] sm:$0xff] }
  0x4b   : > { %v517_v27 = vmul.f32 0.5, %v397_v16  ;;  %v518_v32 = vmul.f32 0.5, %v398_v18  ;;  %v519_v33 = vmul.f32 0.5, %v399_v19  ;;  %v402_v35 = vmul.f32 %v282_v21, %v282_v21  ;;  %v172_v55 = vld [vmem:[%s1139_s3 + $0x88] sm:$0xff]  ;;  %v173_v56 = vld [vmem:[%s1139_s3 + $0x90] sm:$0xff]  ;;  %v174_v61 = vld [vmem:[%s1139_s3 + $0x98] sm:$0xff] }
  0x4c   : > { %v520_v34 = vmul.f32 0.5, %v400_v20  ;;  %635 = vst [vmem:[%s1162_s16] sm:$0xff] %v515_v25  ;;  %636 = vst [vmem:[%s1162_s16 + $0x8] sm:$0xff] %v516_v26  ;;  %v521_v37 = vmul.f32 0.5, %v401_v28  ;;  %v283_v38 = vsub.f32 1.0, %v163_v22  ;;  %v284_v39 = vsub.f32 1.0, %v164_v23  ;;  %v175_v62 = vld [vmem:[%s1139_s3 + $0xa0] sm:$0xff] }
  0x4d   : > { %637 = vst [vmem:[%s1162_s16 + $0x10] sm:$0xff] %v517_v27  ;;  %v285_v40 = vsub.f32 1.0, %v165_v24  ;;  %638 = vst [vmem:[%s1162_s16 + $0x18] sm:$0xff] %v518_v32  ;;  %v522_v42 = vmul.f32 0.5, %v402_v35  ;;  %v286_v43 = vsub.f32 1.0, %v166_v29  ;;  %v287_v44 = vsub.f32 1.0, %v167_v30 }
  0x4e   : > { %639 = vst [vmem:[%s1162_s16 + $0x20] sm:$0xff] %v519_v33  ;;  %640 = vst [vmem:[%s1162_s16 + $0x28] sm:$0xff] %v520_v34  ;;  %v288_v45 = vsub.f32 1.0, %v168_v31  ;;  %v403_v46 = vmul.f32 %v283_v38, %v283_v38  ;;  %v404_v47 = vmul.f32 %v284_v39, %v284_v39  ;;  %v289_v49 = vsub.f32 1.0, %v169_v36  ;;  %v176_v63 = vld [vmem:[%s1139_s3 + $0xa8] sm:$0xff]  ;;  %v177_v4 = vld [vmem:[%s1139_s3 + $0xb0] sm:$0xff] }
  0x4f   : > { %641 = vst [vmem:[%s1162_s16 + $0x30] sm:$0xff] %v521_v37  ;;  %v405_v48 = vmul.f32 %v285_v40, %v285_v40  ;;  %642 = vst [vmem:[%s1162_s16 + $0x38] sm:$0xff] %v522_v42  ;;  %v406_v50 = vmul.f32 %v286_v43, %v286_v43  ;;  %v407_v51 = vmul.f32 %v287_v44, %v287_v44  ;;  %v290_v53 = vsub.f32 1.0, %v170_v41  ;;  %v178_v9 = vld [vmem:[%s1139_s3 + $0xb8] sm:$0xff]  ;;  %v179_v22 = vld [vmem:[%s1139_s3 + $0xc0] sm:$0xff] }
  0x50   : > { %v408_v52 = vmul.f32 %v288_v45, %v288_v45  ;;  %v523_v57 = vmul.f32 0.5, %v403_v46  ;;  %v524_v58 = vmul.f32 0.5, %v404_v47  ;;  %v409_v60 = vmul.f32 %v289_v49, %v289_v49  ;;  %v180_v23 = vld [vmem:[%s1139_s3 + $0xc8] sm:$0xff]  ;;  %v181_v24 = vld [vmem:[%s1139_s3 + $0xd0] sm:$0xff]  ;;  %v182_v29 = vld [vmem:[%s1139_s3 + $0xd8] sm:$0xff] }
  0x51   : > { %v525_v59 = vmul.f32 0.5, %v405_v48  ;;  %v526_v0 = vmul.f32 0.5, %v406_v50  ;;  %v527_v1 = vmul.f32 0.5, %v407_v51  ;;  %v410_v3 = vmul.f32 %v290_v53, %v290_v53  ;;  %v183_v30 = vld [vmem:[%s1139_s3 + $0xe0] sm:$0xff]  ;;  %v184_v31 = vld [vmem:[%s1139_s3 + $0xe8] sm:$0xff]  ;;  %v185_v36 = vld [vmem:[%s1139_s3 + $0xf0] sm:$0xff] }
  0x52   : > { %v528_v2 = vmul.f32 0.5, %v408_v52  ;;  %643 = vst [vmem:[%s1162_s16 + $0x40] sm:$0xff] %v523_v57  ;;  %644 = vst [vmem:[%s1162_s16 + $0x48] sm:$0xff] %v524_v58  ;;  %v529_v5 = vmul.f32 0.5, %v409_v60  ;;  %v291_v6 = vsub.f32 1.0, %v171_v54  ;;  %v292_v7 = vsub.f32 1.0, %v172_v55 }
  0x53   : > { %645 = vst [vmem:[%s1162_s16 + $0x50] sm:$0xff] %v525_v59  ;;  %v293_v8 = vsub.f32 1.0, %v173_v56  ;;  %646 = vst [vmem:[%s1162_s16 + $0x58] sm:$0xff] %v526_v0  ;;  %v530_v10 = vmul.f32 0.5, %v410_v3  ;;  %v294_v11 = vsub.f32 1.0, %v174_v61  ;;  %v295_v12 = vsub.f32 1.0, %v175_v62 }
  0x54   : > { %647 = vst [vmem:[%s1162_s16 + $0x60] sm:$0xff] %v527_v1  ;;  %648 = vst [vmem:[%s1162_s16 + $0x68] sm:$0xff] %v528_v2  ;;  %v296_v13 = vsub.f32 1.0, %v176_v63  ;;  %v411_v14 = vmul.f32 %v291_v6, %v291_v6  ;;  %v412_v15 = vmul.f32 %v292_v7, %v292_v7  ;;  %v297_v17 = vsub.f32 1.0, %v177_v4  ;;  %v186_v41 = vld [vmem:[%s1139_s3 + $0xf8] sm:$0xff]  ;;  %v187_v54 = vld [vmem:[%s1139_s3 + $0x100] sm:$0xff] }
  0x55   : > { %649 = vst [vmem:[%s1162_s16 + $0x70] sm:$0xff] %v529_v5  ;;  %v413_v16 = vmul.f32 %v293_v8, %v293_v8  ;;  %650 = vst [vmem:[%s1162_s16 + $0x78] sm:$0xff] %v530_v10  ;;  %v414_v18 = vmul.f32 %v294_v11, %v294_v11  ;;  %v415_v19 = vmul.f32 %v295_v12, %v295_v12  ;;  %v298_v21 = vsub.f32 1.0, %v178_v9  ;;  %v188_v55 = vld [vmem:[%s1139_s3 + $0x108] sm:$0xff]  ;;  %v189_v56 = vld [vmem:[%s1139_s3 + $0x110] sm:$0xff] }
  0x56   : > { %v416_v20 = vmul.f32 %v296_v13, %v296_v13  ;;  %v531_v25 = vmul.f32 0.5, %v411_v14  ;;  %v532_v26 = vmul.f32 0.5, %v412_v15  ;;  %v417_v28 = vmul.f32 %v297_v17, %v297_v17  ;;  %v190_v61 = vld [vmem:[%s1139_s3 + $0x118] sm:$0xff]  ;;  %v191_v62 = vld [vmem:[%s1139_s3 + $0x120] sm:$0xff]  ;;  %v192_v63 = vld [vmem:[%s1139_s3 + $0x128] sm:$0xff] }
  0x57   : > { %v533_v27 = vmul.f32 0.5, %v413_v16  ;;  %v534_v32 = vmul.f32 0.5, %v414_v18  ;;  %v535_v33 = vmul.f32 0.5, %v415_v19  ;;  %v418_v35 = vmul.f32 %v298_v21, %v298_v21  ;;  %v193_v4 = vld [vmem:[%s1139_s3 + $0x130] sm:$0xff]  ;;  %v194_v9 = vld [vmem:[%s1139_s3 + $0x138] sm:$0xff] }
  0x58   : > { %v536_v34 = vmul.f32 0.5, %v416_v20  ;;  %651 = vst [vmem:[%s1162_s16 + $0x80] sm:$0xff] %v531_v25  ;;  %652 = vst [vmem:[%s1162_s16 + $0x88] sm:$0xff] %v532_v26  ;;  %v537_v37 = vmul.f32 0.5, %v417_v28  ;;  %v299_v38 = vsub.f32 1.0, %v179_v22  ;;  %v300_v39 = vsub.f32 1.0, %v180_v23 }
  0x59   : > { %653 = vst [vmem:[%s1162_s16 + $0x90] sm:$0xff] %v533_v27  ;;  %v301_v40 = vsub.f32 1.0, %v181_v24  ;;  %654 = vst [vmem:[%s1162_s16 + $0x98] sm:$0xff] %v534_v32  ;;  %v538_v42 = vmul.f32 0.5, %v418_v35  ;;  %v302_v43 = vsub.f32 1.0, %v182_v29  ;;  %v303_v44 = vsub.f32 1.0, %v183_v30 }
  0x5a   : > { %655 = vst [vmem:[%s1162_s16 + $0xa0] sm:$0xff] %v535_v33  ;;  %656 = vst [vmem:[%s1162_s16 + $0xa8] sm:$0xff] %v536_v34  ;;  %v304_v45 = vsub.f32 1.0, %v184_v31  ;;  %v419_v46 = vmul.f32 %v299_v38, %v299_v38  ;;  %v420_v47 = vmul.f32 %v300_v39, %v300_v39  ;;  %v305_v49 = vsub.f32 1.0, %v185_v36  ;;  %v195_v22 = vld [vmem:[%s1139_s3 + $0x140] sm:$0xff]  ;;  %v196_v23 = vld [vmem:[%s1139_s3 + $0x148] sm:$0xff] }
  0x5b   : > { %657 = vst [vmem:[%s1162_s16 + $0xb0] sm:$0xff] %v537_v37  ;;  %v421_v48 = vmul.f32 %v301_v40, %v301_v40  ;;  %658 = vst [vmem:[%s1162_s16 + $0xb8] sm:$0xff] %v538_v42  ;;  %v422_v50 = vmul.f32 %v302_v43, %v302_v43  ;;  %v423_v51 = vmul.f32 %v303_v44, %v303_v44  ;;  %v306_v53 = vsub.f32 1.0, %v186_v41  ;;  %v197_v24 = vld [vmem:[%s1139_s3 + $0x150] sm:$0xff]  ;;  %v198_v29 = vld [vmem:[%s1139_s3 + $0x158] sm:$0xff] }
  0x5c   : > { %v424_v52 = vmul.f32 %v304_v45, %v304_v45  ;;  %v539_v57 = vmul.f32 0.5, %v419_v46  ;;  %v540_v58 = vmul.f32 0.5, %v420_v47  ;;  %v425_v60 = vmul.f32 %v305_v49, %v305_v49  ;;  %v199_v30 = vld [vmem:[%s1139_s3 + $0x160] sm:$0xff]  ;;  %v200_v31 = vld [vmem:[%s1139_s3 + $0x168] sm:$0xff]  ;;  %v201_v36 = vld [vmem:[%s1139_s3 + $0x170] sm:$0xff] }
  0x5d   : > { %v541_v59 = vmul.f32 0.5, %v421_v48  ;;  %v542_v0 = vmul.f32 0.5, %v422_v50  ;;  %v543_v1 = vmul.f32 0.5, %v423_v51  ;;  %v426_v3 = vmul.f32 %v306_v53, %v306_v53  ;;  %v202_v41 = vld [vmem:[%s1139_s3 + $0x178] sm:$0xff] }
  0x5e   : > { %v544_v2 = vmul.f32 0.5, %v424_v52  ;;  %659 = vst [vmem:[%s1162_s16 + $0xc0] sm:$0xff] %v539_v57  ;;  %660 = vst [vmem:[%s1162_s16 + $0xc8] sm:$0xff] %v540_v58  ;;  %v545_v5 = vmul.f32 0.5, %v425_v60  ;;  %v307_v6 = vsub.f32 1.0, %v187_v54  ;;  %v308_v7 = vsub.f32 1.0, %v188_v55 }
  0x5f   : > { %661 = vst [vmem:[%s1162_s16 + $0xd0] sm:$0xff] %v541_v59  ;;  %v309_v8 = vsub.f32 1.0, %v189_v56  ;;  %662 = vst [vmem:[%s1162_s16 + $0xd8] sm:$0xff] %v542_v0  ;;  %v546_v10 = vmul.f32 0.5, %v426_v3  ;;  %v310_v11 = vsub.f32 1.0, %v190_v61  ;;  %v311_v12 = vsub.f32 1.0, %v191_v62 }
  0x60   : > { %663 = vst [vmem:[%s1162_s16 + $0xe0] sm:$0xff] %v543_v1  ;;  %664 = vst [vmem:[%s1162_s16 + $0xe8] sm:$0xff] %v544_v2  ;;  %v312_v13 = vsub.f32 1.0, %v192_v63  ;;  %v427_v14 = vmul.f32 %v307_v6, %v307_v6  ;;  %v428_v15 = vmul.f32 %v308_v7, %v308_v7  ;;  %v313_v17 = vsub.f32 1.0, %v193_v4  ;;  %v203_v54 = vld [vmem:[%s1139_s3 + $0x180] sm:$0xff]  ;;  %v204_v55 = vld [vmem:[%s1139_s3 + $0x188] sm:$0xff] }
  0x61   : > { %665 = vst [vmem:[%s1162_s16 + $0xf0] sm:$0xff] %v545_v5  ;;  %v429_v16 = vmul.f32 %v309_v8, %v309_v8  ;;  %666 = vst [vmem:[%s1162_s16 + $0xf8] sm:$0xff] %v546_v10  ;;  %v430_v18 = vmul.f32 %v310_v11, %v310_v11  ;;  %v431_v19 = vmul.f32 %v311_v12, %v311_v12  ;;  %v314_v21 = vsub.f32 1.0, %v194_v9  ;;  %v205_v56 = vld [vmem:[%s1139_s3 + $0x190] sm:$0xff]  ;;  %v206_v61 = vld [vmem:[%s1139_s3 + $0x198] sm:$0xff] }
  0x62   : > { %v432_v20 = vmul.f32 %v312_v13, %v312_v13  ;;  %v547_v25 = vmul.f32 0.5, %v427_v14  ;;  %v548_v26 = vmul.f32 0.5, %v428_v15  ;;  %v433_v28 = vmul.f32 %v313_v17, %v313_v17  ;;  %v207_v62 = vld [vmem:[%s1139_s3 + $0x1a0] sm:$0xff]  ;;  %v208_v63 = vld [vmem:[%s1139_s3 + $0x1a8] sm:$0xff]  ;;  %v209_v4 = vld [vmem:[%s1139_s3 + $0x1b0] sm:$0xff] }
  0x63   : > { %v549_v27 = vmul.f32 0.5, %v429_v16  ;;  %v550_v32 = vmul.f32 0.5, %v430_v18  ;;  %v551_v33 = vmul.f32 0.5, %v431_v19  ;;  %v434_v35 = vmul.f32 %v314_v21, %v314_v21  ;;  %v210_v9 = vld [vmem:[%s1139_s3 + $0x1b8] sm:$0xff] }
  0x64   : > { %v552_v34 = vmul.f32 0.5, %v432_v20  ;;  %667 = vst [vmem:[%s1162_s16 + $0x100] sm:$0xff] %v547_v25  ;;  %668 = vst [vmem:[%s1162_s16 + $0x108] sm:$0xff] %v548_v26  ;;  %v553_v37 = vmul.f32 0.5, %v433_v28  ;;  %v315_v38 = vsub.f32 1.0, %v195_v22  ;;  %v316_v39 = vsub.f32 1.0, %v196_v23 }
  0x65   : > { %669 = vst [vmem:[%s1162_s16 + $0x110] sm:$0xff] %v549_v27  ;;  %v317_v40 = vsub.f32 1.0, %v197_v24  ;;  %670 = vst [vmem:[%s1162_s16 + $0x118] sm:$0xff] %v550_v32  ;;  %v554_v42 = vmul.f32 0.5, %v434_v35  ;;  %v318_v43 = vsub.f32 1.0, %v198_v29  ;;  %v319_v44 = vsub.f32 1.0, %v199_v30 }
  0x66   : > { %671 = vst [vmem:[%s1162_s16 + $0x120] sm:$0xff] %v551_v33  ;;  %672 = vst [vmem:[%s1162_s16 + $0x128] sm:$0xff] %v552_v34  ;;  %v320_v45 = vsub.f32 1.0, %v200_v31  ;;  %v435_v46 = vmul.f32 %v315_v38, %v315_v38  ;;  %v436_v47 = vmul.f32 %v316_v39, %v316_v39  ;;  %v321_v49 = vsub.f32 1.0, %v201_v36  ;;  %v211_v22 = vld [vmem:[%s1139_s3 + $0x1c0] sm:$0xff]  ;;  %v212_v23 = vld [vmem:[%s1139_s3 + $0x1c8] sm:$0xff] }
  0x67   : > { %673 = vst [vmem:[%s1162_s16 + $0x130] sm:$0xff] %v553_v37  ;;  %v437_v48 = vmul.f32 %v317_v40, %v317_v40  ;;  %674 = vst [vmem:[%s1162_s16 + $0x138] sm:$0xff] %v554_v42  ;;  %v438_v50 = vmul.f32 %v318_v43, %v318_v43  ;;  %v439_v51 = vmul.f32 %v319_v44, %v319_v44  ;;  %v322_v53 = vsub.f32 1.0, %v202_v41  ;;  %v213_v24 = vld [vmem:[%s1139_s3 + $0x1d0] sm:$0xff]  ;;  %v214_v29 = vld [vmem:[%s1139_s3 + $0x1d8] sm:$0xff] }
  0x68   : > { %v440_v52 = vmul.f32 %v320_v45, %v320_v45  ;;  %v555_v57 = vmul.f32 0.5, %v435_v46  ;;  %v556_v58 = vmul.f32 0.5, %v436_v47  ;;  %v441_v60 = vmul.f32 %v321_v49, %v321_v49  ;;  %v215_v30 = vld [vmem:[%s1139_s3 + $0x1e0] sm:$0xff]  ;;  %v216_v31 = vld [vmem:[%s1139_s3 + $0x1e8] sm:$0xff]  ;;  %v217_v36 = vld [vmem:[%s1139_s3 + $0x1f0] sm:$0xff] }
  0x69   : > { %v557_v59 = vmul.f32 0.5, %v437_v48  ;;  %v558_v0 = vmul.f32 0.5, %v438_v50  ;;  %v559_v1 = vmul.f32 0.5, %v439_v51  ;;  %v442_v3 = vmul.f32 %v322_v53, %v322_v53  ;;  %v218_v41 = vld [vmem:[%s1139_s3 + $0x1f8] sm:$0xff] }
  0x6a   : > { %v560_v2 = vmul.f32 0.5, %v440_v52  ;;  %675 = vst [vmem:[%s1162_s16 + $0x140] sm:$0xff] %v555_v57  ;;  %676 = vst [vmem:[%s1162_s16 + $0x148] sm:$0xff] %v556_v58  ;;  %v561_v5 = vmul.f32 0.5, %v441_v60  ;;  %v323_v6 = vsub.f32 1.0, %v203_v54  ;;  %v324_v7 = vsub.f32 1.0, %v204_v55 }
  0x6b   : > { %677 = vst [vmem:[%s1162_s16 + $0x150] sm:$0xff] %v557_v59  ;;  %v325_v8 = vsub.f32 1.0, %v205_v56  ;;  %678 = vst [vmem:[%s1162_s16 + $0x158] sm:$0xff] %v558_v0  ;;  %v562_v10 = vmul.f32 0.5, %v442_v3  ;;  %v326_v11 = vsub.f32 1.0, %v206_v61  ;;  %v327_v12 = vsub.f32 1.0, %v207_v62 }
  0x6c   : > { %679 = vst [vmem:[%s1162_s16 + $0x160] sm:$0xff] %v559_v1  ;;  %680 = vst [vmem:[%s1162_s16 + $0x168] sm:$0xff] %v560_v2  ;;  %v328_v13 = vsub.f32 1.0, %v208_v63  ;;  %v443_v14 = vmul.f32 %v323_v6, %v323_v6  ;;  %v444_v15 = vmul.f32 %v324_v7, %v324_v7  ;;  %v329_v17 = vsub.f32 1.0, %v209_v4  ;;  %v219_v54 = vld [vmem:[%s1139_s3 + $0x200] sm:$0xff]  ;;  %v220_v55 = vld [vmem:[%s1139_s3 + $0x208] sm:$0xff] }
  0x6d   : > { %681 = vst [vmem:[%s1162_s16 + $0x170] sm:$0xff] %v561_v5  ;;  %v445_v16 = vmul.f32 %v325_v8, %v325_v8  ;;  %682 = vst [vmem:[%s1162_s16 + $0x178] sm:$0xff] %v562_v10  ;;  %v446_v18 = vmul.f32 %v326_v11, %v326_v11  ;;  %v447_v19 = vmul.f32 %v327_v12, %v327_v12  ;;  %v330_v21 = vsub.f32 1.0, %v210_v9  ;;  %v221_v56 = vld [vmem:[%s1139_s3 + $0x210] sm:$0xff]  ;;  %v222_v61 = vld [vmem:[%s1139_s3 + $0x218] sm:$0xff] }
  0x6e   : > { %v448_v20 = vmul.f32 %v328_v13, %v328_v13  ;;  %v563_v25 = vmul.f32 0.5, %v443_v14  ;;  %v564_v26 = vmul.f32 0.5, %v444_v15  ;;  %v449_v28 = vmul.f32 %v329_v17, %v329_v17  ;;  %v223_v62 = vld [vmem:[%s1139_s3 + $0x220] sm:$0xff]  ;;  %v224_v63 = vld [vmem:[%s1139_s3 + $0x228] sm:$0xff]  ;;  %v225_v4 = vld [vmem:[%s1139_s3 + $0x230] sm:$0xff] }
  0x6f   : > { %v565_v27 = vmul.f32 0.5, %v445_v16  ;;  %v566_v32 = vmul.f32 0.5, %v446_v18  ;;  %v567_v33 = vmul.f32 0.5, %v447_v19  ;;  %v450_v35 = vmul.f32 %v330_v21, %v330_v21  ;;  %v226_v9 = vld [vmem:[%s1139_s3 + $0x238] sm:$0xff] }
  0x70   : > { %v568_v34 = vmul.f32 0.5, %v448_v20  ;;  %683 = vst [vmem:[%s1162_s16 + $0x180] sm:$0xff] %v563_v25  ;;  %684 = vst [vmem:[%s1162_s16 + $0x188] sm:$0xff] %v564_v26  ;;  %v569_v37 = vmul.f32 0.5, %v449_v28  ;;  %v331_v38 = vsub.f32 1.0, %v211_v22  ;;  %v332_v39 = vsub.f32 1.0, %v212_v23 }
  0x71   : > { %685 = vst [vmem:[%s1162_s16 + $0x190] sm:$0xff] %v565_v27  ;;  %v333_v40 = vsub.f32 1.0, %v213_v24  ;;  %686 = vst [vmem:[%s1162_s16 + $0x198] sm:$0xff] %v566_v32  ;;  %v570_v42 = vmul.f32 0.5, %v450_v35  ;;  %v334_v43 = vsub.f32 1.0, %v214_v29  ;;  %v335_v44 = vsub.f32 1.0, %v215_v30 }
  0x72   : > { %687 = vst [vmem:[%s1162_s16 + $0x1a0] sm:$0xff] %v567_v33  ;;  %688 = vst [vmem:[%s1162_s16 + $0x1a8] sm:$0xff] %v568_v34  ;;  %v336_v45 = vsub.f32 1.0, %v216_v31  ;;  %v451_v46 = vmul.f32 %v331_v38, %v331_v38  ;;  %v452_v47 = vmul.f32 %v332_v39, %v332_v39  ;;  %v337_v49 = vsub.f32 1.0, %v217_v36  ;;  %v227_v22 = vld [vmem:[%s1139_s3 + $0x240] sm:$0xff]  ;;  %v228_v23 = vld [vmem:[%s1139_s3 + $0x248] sm:$0xff] }
  0x73   : > { %689 = vst [vmem:[%s1162_s16 + $0x1b0] sm:$0xff] %v569_v37  ;;  %v453_v48 = vmul.f32 %v333_v40, %v333_v40  ;;  %690 = vst [vmem:[%s1162_s16 + $0x1b8] sm:$0xff] %v570_v42  ;;  %v454_v50 = vmul.f32 %v334_v43, %v334_v43  ;;  %v455_v51 = vmul.f32 %v335_v44, %v335_v44  ;;  %v338_v53 = vsub.f32 1.0, %v218_v41  ;;  %v229_v24 = vld [vmem:[%s1139_s3 + $0x250] sm:$0xff]  ;;  %v230_v29 = vld [vmem:[%s1139_s3 + $0x258] sm:$0xff] }
  0x74   : > { %v456_v52 = vmul.f32 %v336_v45, %v336_v45  ;;  %v571_v57 = vmul.f32 0.5, %v451_v46  ;;  %v572_v58 = vmul.f32 0.5, %v452_v47  ;;  %v457_v60 = vmul.f32 %v337_v49, %v337_v49  ;;  %v231_v30 = vld [vmem:[%s1139_s3 + $0x260] sm:$0xff]  ;;  %v232_v31 = vld [vmem:[%s1139_s3 + $0x268] sm:$0xff]  ;;  %v233_v36 = vld [vmem:[%s1139_s3 + $0x270] sm:$0xff] }
  0x75   : > { %v573_v59 = vmul.f32 0.5, %v453_v48  ;;  %v574_v0 = vmul.f32 0.5, %v454_v50  ;;  %v575_v1 = vmul.f32 0.5, %v455_v51  ;;  %v458_v3 = vmul.f32 %v338_v53, %v338_v53  ;;  %v234_v41 = vld [vmem:[%s1139_s3 + $0x278] sm:$0xff] }
  0x76   : > { %v576_v2 = vmul.f32 0.5, %v456_v52  ;;  %691 = vst [vmem:[%s1162_s16 + $0x1c0] sm:$0xff] %v571_v57  ;;  %692 = vst [vmem:[%s1162_s16 + $0x1c8] sm:$0xff] %v572_v58  ;;  %v577_v5 = vmul.f32 0.5, %v457_v60  ;;  %v339_v6 = vsub.f32 1.0, %v219_v54  ;;  %v340_v7 = vsub.f32 1.0, %v220_v55 }
  0x77   : > { %693 = vst [vmem:[%s1162_s16 + $0x1d0] sm:$0xff] %v573_v59  ;;  %v341_v8 = vsub.f32 1.0, %v221_v56  ;;  %694 = vst [vmem:[%s1162_s16 + $0x1d8] sm:$0xff] %v574_v0  ;;  %v578_v10 = vmul.f32 0.5, %v458_v3  ;;  %v342_v11 = vsub.f32 1.0, %v222_v61  ;;  %v343_v12 = vsub.f32 1.0, %v223_v62 }
  0x78   : > { %695 = vst [vmem:[%s1162_s16 + $0x1e0] sm:$0xff] %v575_v1  ;;  %696 = vst [vmem:[%s1162_s16 + $0x1e8] sm:$0xff] %v576_v2  ;;  %v344_v13 = vsub.f32 1.0, %v224_v63  ;;  %v459_v14 = vmul.f32 %v339_v6, %v339_v6  ;;  %v460_v15 = vmul.f32 %v340_v7, %v340_v7  ;;  %v345_v17 = vsub.f32 1.0, %v225_v4  ;;  %v235_v54 = vld [vmem:[%s1139_s3 + $0x280] sm:$0xff]  ;;  %v236_v55 = vld [vmem:[%s1139_s3 + $0x288] sm:$0xff] }
  0x79   : > { %697 = vst [vmem:[%s1162_s16 + $0x1f0] sm:$0xff] %v577_v5  ;;  %v461_v16 = vmul.f32 %v341_v8, %v341_v8  ;;  %698 = vst [vmem:[%s1162_s16 + $0x1f8] sm:$0xff] %v578_v10  ;;  %v462_v18 = vmul.f32 %v342_v11, %v342_v11  ;;  %v463_v19 = vmul.f32 %v343_v12, %v343_v12  ;;  %v346_v21 = vsub.f32 1.0, %v226_v9  ;;  %v237_v56 = vld [vmem:[%s1139_s3 + $0x290] sm:$0xff]  ;;  %v238_v61 = vld [vmem:[%s1139_s3 + $0x298] sm:$0xff] }
  0x7a   : > { %v464_v20 = vmul.f32 %v344_v13, %v344_v13  ;;  %v579_v25 = vmul.f32 0.5, %v459_v14  ;;  %v580_v26 = vmul.f32 0.5, %v460_v15  ;;  %v465_v28 = vmul.f32 %v345_v17, %v345_v17  ;;  %v239_v62 = vld [vmem:[%s1139_s3 + $0x2a0] sm:$0xff]  ;;  %v240_v63 = vld [vmem:[%s1139_s3 + $0x2a8] sm:$0xff]  ;;  %v241_v4 = vld [vmem:[%s1139_s3 + $0x2b0] sm:$0xff] }
  0x7b   : > { %v581_v27 = vmul.f32 0.5, %v461_v16  ;;  %v582_v32 = vmul.f32 0.5, %v462_v18  ;;  %v583_v33 = vmul.f32 0.5, %v463_v19  ;;  %v466_v35 = vmul.f32 %v346_v21, %v346_v21  ;;  %v242_v9 = vld [vmem:[%s1139_s3 + $0x2b8] sm:$0xff] }
  0x7c   : > { %v584_v34 = vmul.f32 0.5, %v464_v20  ;;  %699 = vst [vmem:[%s1162_s16 + $0x200] sm:$0xff] %v579_v25  ;;  %700 = vst [vmem:[%s1162_s16 + $0x208] sm:$0xff] %v580_v26  ;;  %v585_v37 = vmul.f32 0.5, %v465_v28  ;;  %v347_v38 = vsub.f32 1.0, %v227_v22  ;;  %v348_v39 = vsub.f32 1.0, %v228_v23 }
  0x7d   : > { %701 = vst [vmem:[%s1162_s16 + $0x210] sm:$0xff] %v581_v27  ;;  %v349_v40 = vsub.f32 1.0, %v229_v24  ;;  %702 = vst [vmem:[%s1162_s16 + $0x218] sm:$0xff] %v582_v32  ;;  %v586_v42 = vmul.f32 0.5, %v466_v35  ;;  %v350_v43 = vsub.f32 1.0, %v230_v29  ;;  %v351_v44 = vsub.f32 1.0, %v231_v30 }
  0x7e   : > { %703 = vst [vmem:[%s1162_s16 + $0x220] sm:$0xff] %v583_v33  ;;  %704 = vst [vmem:[%s1162_s16 + $0x228] sm:$0xff] %v584_v34  ;;  %v352_v45 = vsub.f32 1.0, %v232_v31  ;;  %v467_v46 = vmul.f32 %v347_v38, %v347_v38  ;;  %v468_v47 = vmul.f32 %v348_v39, %v348_v39  ;;  %v353_v49 = vsub.f32 1.0, %v233_v36  ;;  %v243_v22 = vld [vmem:[%s1139_s3 + $0x2c0] sm:$0xff]  ;;  %v244_v23 = vld [vmem:[%s1139_s3 + $0x2c8] sm:$0xff] }
  0x7f   : > { %705 = vst [vmem:[%s1162_s16 + $0x230] sm:$0xff] %v585_v37  ;;  %v469_v48 = vmul.f32 %v349_v40, %v349_v40  ;;  %706 = vst [vmem:[%s1162_s16 + $0x238] sm:$0xff] %v586_v42  ;;  %v470_v50 = vmul.f32 %v350_v43, %v350_v43  ;;  %v471_v51 = vmul.f32 %v351_v44, %v351_v44  ;;  %v354_v53 = vsub.f32 1.0, %v234_v41  ;;  %v245_v24 = vld [vmem:[%s1139_s3 + $0x2d0] sm:$0xff]  ;;  %v246_v29 = vld [vmem:[%s1139_s3 + $0x2d8] sm:$0xff] }
  0x80   : > { %v472_v52 = vmul.f32 %v352_v45, %v352_v45  ;;  %v587_v57 = vmul.f32 0.5, %v467_v46  ;;  %v588_v58 = vmul.f32 0.5, %v468_v47  ;;  %v473_v60 = vmul.f32 %v353_v49, %v353_v49  ;;  %v247_v30 = vld [vmem:[%s1139_s3 + $0x2e0] sm:$0xff]  ;;  %v248_v31 = vld [vmem:[%s1139_s3 + $0x2e8] sm:$0xff]  ;;  %v249_v36 = vld [vmem:[%s1139_s3 + $0x2f0] sm:$0xff] }
  0x81   : > { %v589_v59 = vmul.f32 0.5, %v469_v48  ;;  %v590_v0 = vmul.f32 0.5, %v470_v50  ;;  %v591_v1 = vmul.f32 0.5, %v471_v51  ;;  %v474_v3 = vmul.f32 %v354_v53, %v354_v53  ;;  %v250_v41 = vld [vmem:[%s1139_s3 + $0x2f8] sm:$0xff] }
  0x82   : > { %v592_v2 = vmul.f32 0.5, %v472_v52  ;;  %707 = vst [vmem:[%s1162_s16 + $0x240] sm:$0xff] %v587_v57  ;;  %708 = vst [vmem:[%s1162_s16 + $0x248] sm:$0xff] %v588_v58  ;;  %v593_v5 = vmul.f32 0.5, %v473_v60  ;;  %v355_v6 = vsub.f32 1.0, %v235_v54  ;;  %v356_v7 = vsub.f32 1.0, %v236_v55 }
  0x83   : > { %709 = vst [vmem:[%s1162_s16 + $0x250] sm:$0xff] %v589_v59  ;;  %v357_v8 = vsub.f32 1.0, %v237_v56  ;;  %710 = vst [vmem:[%s1162_s16 + $0x258] sm:$0xff] %v590_v0  ;;  %v594_v10 = vmul.f32 0.5, %v474_v3  ;;  %v358_v11 = vsub.f32 1.0, %v238_v61  ;;  %v359_v12 = vsub.f32 1.0, %v239_v62 }
  0x84   : > { %711 = vst [vmem:[%s1162_s16 + $0x260] sm:$0xff] %v591_v1  ;;  %712 = vst [vmem:[%s1162_s16 + $0x268] sm:$0xff] %v592_v2  ;;  %v360_v13 = vsub.f32 1.0, %v240_v63  ;;  %v475_v14 = vmul.f32 %v355_v6, %v355_v6  ;;  %v476_v15 = vmul.f32 %v356_v7, %v356_v7  ;;  %v361_v17 = vsub.f32 1.0, %v241_v4  ;;  %v251_v54 = vld [vmem:[%s1139_s3 + $0x300] sm:$0xff]  ;;  %v252_v55 = vld [vmem:[%s1139_s3 + $0x308] sm:$0xff] }
  0x85   : > { %713 = vst [vmem:[%s1162_s16 + $0x270] sm:$0xff] %v593_v5  ;;  %v477_v16 = vmul.f32 %v357_v8, %v357_v8  ;;  %714 = vst [vmem:[%s1162_s16 + $0x278] sm:$0xff] %v594_v10  ;;  %v478_v18 = vmul.f32 %v358_v11, %v358_v11  ;;  %v479_v19 = vmul.f32 %v359_v12, %v359_v12  ;;  %v362_v21 = vsub.f32 1.0, %v242_v9  ;;  %v253_v56 = vld [vmem:[%s1139_s3 + $0x310] sm:$0xff]  ;;  %v254_v61 = vld [vmem:[%s1139_s3 + $0x318] sm:$0xff] }
  0x86   : > { %v480_v20 = vmul.f32 %v360_v13, %v360_v13  ;;  %v595_v25 = vmul.f32 0.5, %v475_v14  ;;  %v596_v26 = vmul.f32 0.5, %v476_v15  ;;  %v481_v28 = vmul.f32 %v361_v17, %v361_v17  ;;  %v255_v62 = vld [vmem:[%s1139_s3 + $0x320] sm:$0xff]  ;;  %v256_v63 = vld [vmem:[%s1139_s3 + $0x328] sm:$0xff]  ;;  %v257_v4 = vld [vmem:[%s1139_s3 + $0x330] sm:$0xff] }
  0x87   : > { %v597_v27 = vmul.f32 0.5, %v477_v16  ;;  %v598_v32 = vmul.f32 0.5, %v478_v18  ;;  %v599_v33 = vmul.f32 0.5, %v479_v19  ;;  %v482_v35 = vmul.f32 %v362_v21, %v362_v21  ;;  %v258_v9 = vld [vmem:[%s1139_s3 + $0x338] sm:$0xff] }
  0x88   : > { %v600_v34 = vmul.f32 0.5, %v480_v20  ;;  %715 = vst [vmem:[%s1162_s16 + $0x280] sm:$0xff] %v595_v25  ;;  %716 = vst [vmem:[%s1162_s16 + $0x288] sm:$0xff] %v596_v26  ;;  %v601_v37 = vmul.f32 0.5, %v481_v28  ;;  %v363_v38 = vsub.f32 1.0, %v243_v22  ;;  %v364_v39 = vsub.f32 1.0, %v244_v23 }
  0x89   : > { %717 = vst [vmem:[%s1162_s16 + $0x290] sm:$0xff] %v597_v27  ;;  %v365_v40 = vsub.f32 1.0, %v245_v24  ;;  %718 = vst [vmem:[%s1162_s16 + $0x298] sm:$0xff] %v598_v32  ;;  %v602_v42 = vmul.f32 0.5, %v482_v35  ;;  %v366_v43 = vsub.f32 1.0, %v246_v29  ;;  %v367_v44 = vsub.f32 1.0, %v247_v30 }
  0x8a   : > { %719 = vst [vmem:[%s1162_s16 + $0x2a0] sm:$0xff] %v599_v33  ;;  %720 = vst [vmem:[%s1162_s16 + $0x2a8] sm:$0xff] %v600_v34  ;;  %v368_v45 = vsub.f32 1.0, %v248_v31  ;;  %v483_v46 = vmul.f32 %v363_v38, %v363_v38  ;;  %v484_v47 = vmul.f32 %v364_v39, %v364_v39  ;;  %v369_v49 = vsub.f32 1.0, %v249_v36  ;;  %v259_v22 = vld [vmem:[%s1139_s3 + $0x340] sm:$0xff]  ;;  %v260_v23 = vld [vmem:[%s1139_s3 + $0x348] sm:$0xff] }
  0x8b   : > { %721 = vst [vmem:[%s1162_s16 + $0x2b0] sm:$0xff] %v601_v37  ;;  %v485_v48 = vmul.f32 %v365_v40, %v365_v40  ;;  %722 = vst [vmem:[%s1162_s16 + $0x2b8] sm:$0xff] %v602_v42  ;;  %v486_v50 = vmul.f32 %v366_v43, %v366_v43  ;;  %v487_v51 = vmul.f32 %v367_v44, %v367_v44  ;;  %v370_v53 = vsub.f32 1.0, %v250_v41  ;;  %v261_v24 = vld [vmem:[%s1139_s3 + $0x350] sm:$0xff]  ;;  %v262_v29 = vld [vmem:[%s1139_s3 + $0x358] sm:$0xff] }
  0x8c   : > { %v488_v52 = vmul.f32 %v368_v45, %v368_v45  ;;  %v603_v57 = vmul.f32 0.5, %v483_v46  ;;  %v604_v58 = vmul.f32 0.5, %v484_v47  ;;  %v489_v60 = vmul.f32 %v369_v49, %v369_v49  ;;  %v263_v30 = vld [vmem:[%s1139_s3 + $0x360] sm:$0xff]  ;;  %v264_v31 = vld [vmem:[%s1139_s3 + $0x368] sm:$0xff]  ;;  %v265_v36 = vld [vmem:[%s1139_s3 + $0x370] sm:$0xff] }
  0x8d   : > { %v605_v59 = vmul.f32 0.5, %v485_v48  ;;  %v606_v0 = vmul.f32 0.5, %v486_v50  ;;  %v607_v1 = vmul.f32 0.5, %v487_v51  ;;  %v490_v3 = vmul.f32 %v370_v53, %v370_v53  ;;  %v266_v41 = vld [vmem:[%s1139_s3 + $0x378] sm:$0xff] }
  0x8e   : > { %v608_v2 = vmul.f32 0.5, %v488_v52  ;;  %723 = vst [vmem:[%s1162_s16 + $0x2c0] sm:$0xff] %v603_v57  ;;  %724 = vst [vmem:[%s1162_s16 + $0x2c8] sm:$0xff] %v604_v58  ;;  %v609_v5 = vmul.f32 0.5, %v489_v60  ;;  %v371_v6 = vsub.f32 1.0, %v251_v54  ;;  %v372_v7 = vsub.f32 1.0, %v252_v55 }
  0x8f   : > { %725 = vst [vmem:[%s1162_s16 + $0x2d0] sm:$0xff] %v605_v59  ;;  %v373_v8 = vsub.f32 1.0, %v253_v56  ;;  %726 = vst [vmem:[%s1162_s16 + $0x2d8] sm:$0xff] %v606_v0  ;;  %v610_v10 = vmul.f32 0.5, %v490_v3  ;;  %v374_v11 = vsub.f32 1.0, %v254_v61  ;;  %v375_v12 = vsub.f32 1.0, %v255_v62 }
  0x90   : > { %727 = vst [vmem:[%s1162_s16 + $0x2e0] sm:$0xff] %v607_v1  ;;  %728 = vst [vmem:[%s1162_s16 + $0x2e8] sm:$0xff] %v608_v2  ;;  %v376_v13 = vsub.f32 1.0, %v256_v63  ;;  %v491_v14 = vmul.f32 %v371_v6, %v371_v6  ;;  %v492_v15 = vmul.f32 %v372_v7, %v372_v7  ;;  %v377_v17 = vsub.f32 1.0, %v257_v4  ;;  %v267_v54 = vld [vmem:[%s1139_s3 + $0x380] sm:$0xff]  ;;  %v268_v55 = vld [vmem:[%s1139_s3 + $0x388] sm:$0xff] }
  0x91   : > { %729 = vst [vmem:[%s1162_s16 + $0x2f0] sm:$0xff] %v609_v5  ;;  %v493_v16 = vmul.f32 %v373_v8, %v373_v8  ;;  %730 = vst [vmem:[%s1162_s16 + $0x2f8] sm:$0xff] %v610_v10  ;;  %v494_v18 = vmul.f32 %v374_v11, %v374_v11  ;;  %v495_v19 = vmul.f32 %v375_v12, %v375_v12  ;;  %v378_v21 = vsub.f32 1.0, %v258_v9  ;;  %v269_v56 = vld [vmem:[%s1139_s3 + $0x390] sm:$0xff]  ;;  %v270_v61 = vld [vmem:[%s1139_s3 + $0x398] sm:$0xff] }
  0x92   : > { %v496_v20 = vmul.f32 %v376_v13, %v376_v13  ;;  %v611_v25 = vmul.f32 0.5, %v491_v14  ;;  %v612_v26 = vmul.f32 0.5, %v492_v15  ;;  %v497_v28 = vmul.f32 %v377_v17, %v377_v17  ;;  %v271_v62 = vld [vmem:[%s1139_s3 + $0x3a0] sm:$0xff]  ;;  %v272_v63 = vld [vmem:[%s1139_s3 + $0x3a8] sm:$0xff]  ;;  %v273_v4 = vld [vmem:[%s1139_s3 + $0x3b0] sm:$0xff] }
  0x93   : > { %v613_v27 = vmul.f32 0.5, %v493_v16  ;;  %v614_v32 = vmul.f32 0.5, %v494_v18  ;;  %v615_v33 = vmul.f32 0.5, %v495_v19  ;;  %v498_v35 = vmul.f32 %v378_v21, %v378_v21  ;;  %v274_v9 = vld [vmem:[%s1139_s3 + $0x3b8] sm:$0xff] }
  0x94   : > { %v616_v34 = vmul.f32 0.5, %v496_v20  ;;  %731 = vst [vmem:[%s1162_s16 + $0x300] sm:$0xff] %v611_v25  ;;  %732 = vst [vmem:[%s1162_s16 + $0x308] sm:$0xff] %v612_v26  ;;  %v617_v37 = vmul.f32 0.5, %v497_v28  ;;  %v379_v38 = vsub.f32 1.0, %v259_v22  ;;  %v380_v39 = vsub.f32 1.0, %v260_v23 }
  0x95   : > { %733 = vst [vmem:[%s1162_s16 + $0x310] sm:$0xff] %v613_v27  ;;  %v381_v40 = vsub.f32 1.0, %v261_v24  ;;  %734 = vst [vmem:[%s1162_s16 + $0x318] sm:$0xff] %v614_v32  ;;  %v618_v42 = vmul.f32 0.5, %v498_v35  ;;  %v382_v43 = vsub.f32 1.0, %v262_v29  ;;  %v383_v44 = vsub.f32 1.0, %v263_v30 }
  0x96   : > { %735 = vst [vmem:[%s1162_s16 + $0x320] sm:$0xff] %v615_v33  ;;  %736 = vst [vmem:[%s1162_s16 + $0x328] sm:$0xff] %v616_v34  ;;  %v384_v45 = vsub.f32 1.0, %v264_v31  ;;  %v499_v46 = vmul.f32 %v379_v38, %v379_v38  ;;  %v500_v47 = vmul.f32 %v380_v39, %v380_v39  ;;  %v385_v49 = vsub.f32 1.0, %v265_v36 }
  0x97   : > { %737 = vst [vmem:[%s1162_s16 + $0x330] sm:$0xff] %v617_v37  ;;  %v501_v48 = vmul.f32 %v381_v40, %v381_v40  ;;  %738 = vst [vmem:[%s1162_s16 + $0x338] sm:$0xff] %v618_v42  ;;  %v502_v50 = vmul.f32 %v382_v43, %v382_v43  ;;  %v503_v51 = vmul.f32 %v383_v44, %v383_v44  ;;  %v386_v53 = vsub.f32 1.0, %v266_v41 }
  0x98   : > { %v504_v52 = vmul.f32 %v384_v45, %v384_v45  ;;  %v619_v57 = vmul.f32 0.5, %v499_v46  ;;  %v620_v58 = vmul.f32 0.5, %v500_v47  ;;  %v505_v60 = vmul.f32 %v385_v49, %v385_v49 }
  0x99   : > { %v621_v59 = vmul.f32 0.5, %v501_v48  ;;  %v622_v0 = vmul.f32 0.5, %v502_v50  ;;  %v623_v1 = vmul.f32 0.5, %v503_v51  ;;  %v506_v3 = vmul.f32 %v386_v53, %v386_v53 }
  0x9a   : > { %v624_v2 = vmul.f32 0.5, %v504_v52  ;;  %739 = vst [vmem:[%s1162_s16 + $0x340] sm:$0xff] %v619_v57  ;;  %740 = vst [vmem:[%s1162_s16 + $0x348] sm:$0xff] %v620_v58  ;;  %v625_v5 = vmul.f32 0.5, %v505_v60  ;;  %v387_v6 = vsub.f32 1.0, %v267_v54  ;;  %v388_v7 = vsub.f32 1.0, %v268_v55 }
  0x9b   : > { %741 = vst [vmem:[%s1162_s16 + $0x350] sm:$0xff] %v621_v59  ;;  %v389_v8 = vsub.f32 1.0, %v269_v56  ;;  %742 = vst [vmem:[%s1162_s16 + $0x358] sm:$0xff] %v622_v0  ;;  %v626_v10 = vmul.f32 0.5, %v506_v3  ;;  %v390_v11 = vsub.f32 1.0, %v270_v61  ;;  %v391_v12 = vsub.f32 1.0, %v271_v62 }
  0x9c   : > { %743 = vst [vmem:[%s1162_s16 + $0x360] sm:$0xff] %v623_v1  ;;  %744 = vst [vmem:[%s1162_s16 + $0x368] sm:$0xff] %v624_v2  ;;  %v392_v13 = vsub.f32 1.0, %v272_v63  ;;  %v507_v14 = vmul.f32 %v387_v6, %v387_v6  ;;  %v508_v15 = vmul.f32 %v388_v7, %v388_v7  ;;  %v393_v17 = vsub.f32 1.0, %v273_v4 }
  0x9d   : > { %745 = vst [vmem:[%s1162_s16 + $0x370] sm:$0xff] %v625_v5  ;;  %v509_v16 = vmul.f32 %v389_v8, %v389_v8  ;;  %746 = vst [vmem:[%s1162_s16 + $0x378] sm:$0xff] %v626_v10  ;;  %v510_v18 = vmul.f32 %v390_v11, %v390_v11  ;;  %v511_v19 = vmul.f32 %v391_v12, %v391_v12  ;;  %v394_v21 = vsub.f32 1.0, %v274_v9  ;;  %762 = sbr.rel (!%p1079_p9) target bundleno = 192 (0xc0), region = 32 }
  0x9e   : > { %v512_v20 = vmul.f32 %v392_v13, %v392_v13  ;;  %v627_v22 = vmul.f32 0.5, %v507_v14  ;;  %v628_v23 = vmul.f32 0.5, %v508_v15  ;;  %v513_v25 = vmul.f32 %v393_v17, %v393_v17 }
  0x9f   : > { %v629_v24 = vmul.f32 0.5, %v509_v16  ;;  %v630_v26 = vmul.f32 0.5, %v510_v18  ;;  %v631_v27 = vmul.f32 0.5, %v511_v19  ;;  %v514_v29 = vmul.f32 %v394_v21, %v394_v21 }
  0xa0   : > { %v632_v28 = vmul.f32 0.5, %v512_v20  ;;  %747 = vst [vmem:[%s1162_s16 + $0x380] sm:$0xff] %v627_v22  ;;  %748 = vst [vmem:[%s1162_s16 + $0x388] sm:$0xff] %v628_v23  ;;  %v633_v30 = vmul.f32 0.5, %v513_v25 }
  0xa1   : > { %749 = vst [vmem:[%s1162_s16 + $0x390] sm:$0xff] %v629_v24  ;;  %750 = vst [vmem:[%s1162_s16 + $0x398] sm:$0xff] %v630_v26  ;;  %v634_v31 = vmul.f32 0.5, %v514_v29 }
  0xa2   : > { %751 = vst [vmem:[%s1162_s16 + $0x3a0] sm:$0xff] %v631_v27  ;;  %752 = vst [vmem:[%s1162_s16 + $0x3a8] sm:$0xff] %v632_v28 }
  0xa3   : > { %753 = vst [vmem:[%s1162_s16 + $0x3b0] sm:$0xff] %v633_v30  ;;  %754 = vst [vmem:[%s1162_s16 + $0x3b8] sm:$0xff] %v634_v31 }
  0xa4   : > { %s1464_s28 = smov (!%p765_p6, %s764_s28), 30 }
  0xa5   : > { %s1393_s2 = sshll.u32 %s1464_s28, 9 }
  0xa6   : > { %s770_s4 = ssub.s32 15360, %s1393_s2 }
  0xa7   : > { %771 = vsyncadd %s756_s23, %s770_s4  ;;  %p863_p10 = scmp.ne.s32.totalorder %s1393_s2, 0  ;;  %s877_s17 = smul.u32 15360, %s1056_s10 }
  0xa8   : > { %s777_s5 = sshll.u32 %s1162_s16, 4  ;;  %s1022_s20 = smov [#allocation5]   ;;  %s1406_s5 = int_to_ptr.vmem [resolvable:$true] %s777_s5 }
  0xa9   : > { %s1404_s14 = scalar_lea.hbm %s1452_s1, %s877_s17  ;;  %s951_s19 = scalar_lea.vmem %s1406_s5, %s1393_s2 }
  0xaa   : > { %p952_p9 = scmp.ne.s32.totalorder %s1406_s5, %s951_s19  ;;  %s955_s21 = sshll.u32 %s1022_s20, 4  ;;  %s956_s21 = int_to_ptr.vmem [resolvable:$false] %s955_s21 }
  0xab   : > { %s957_s10 = scalar_lea.vmem %s956_s21, 30720  ;;  %p958_p12 = scmp.lt.s32.totalorder %s1406_s5, %s956_s21 }
  0xac   : > { %p953_p13 = pnand %p952_p9, %p863_p10  ;;  %p959_p0 = scmp.lt.s32.totalorder %s957_s10, %s951_s19 }
  0xae   : > { %p954_p11 = pneg %p953_p13  ;;  %p960_p1 = por %p959_p0, %p958_p12 }
  0xb0   : > { %p961_p3 = pnand %p960_p1, %p954_p11 }
  0xb2   : > { %964 = shalt.err (!%p961_p3)
}
  0xb3   : > { %s965_s22 = scalar_lea.hbm %s1404_s14, %s1393_s2  ;;  %s969_s29 = scalar_lea.hbm %s1452_s1, 63488 }
  0xb4   : > { %p966_p4 = scmp.ne.s32.totalorder %s1404_s14, %s965_s22  ;;  %p970_p7 = scmp.lt.u32.totalorder %s1404_s14, %s1452_s1 }
  0xb5   : > { %p971_p8 = scmp.lt.u32.totalorder %s969_s29, %s965_s22  ;;  %p973_p9 = scmp.lt.u32.totalorder %s965_s22, %s1404_s14 }
  0xb6   : > { %p967_p5 = pnand %p966_p4, %p863_p10 }
  0xb7   : > { %p972_p6 = por %p971_p8, %p970_p7 }
  0xb8   : > { %p968_p2 = pneg %p967_p5 }
  0xb9   : > { %p974_p13 = por %p973_p9, %p972_p6 }
  0xbb   : > { %p975_p11 = pnand %p974_p13, %p968_p2 }
  0xbd   : > { %978 = shalt.err (!%p975_p11)
}
  0xbe   : > { %s1023_s16 = smov 512   ;;  %s1024_s25 = smov 32  }
  0xbf   : > { %783 = dma.vmem_to_hbm [thread:$0]  (%p863_p10), %s1406_s5, %s1393_s2, %s1404_s14, %s756_s23, %s1023_s16, %s1023_s16, %s1024_s25  }
  0xc0 PF: > { %p886_p12 = scmp.ge.s32.totalorder %s1017_s9, 2  ;;  %s792_s28 = sand.u32 1, %s1005_s6  }
  0xc1   : > { %p1456_p0 = scmp.ne.s32.totalorder %s1455_s18, 0  ;;  %s793_s4 = scalar_lea.sflag [#allocation4], %s792_s28 }
  0xc3   : > { %p883_p1 = pnand %p886_p12, %p1456_p0 }
  0xc5   : > { %1000 = dma.done.wait (!%p883_p1), %s793_s4, 15360  }
  0xc6   : > { %1002 = vsyncadd (!%p883_p1), %s793_s4, 4294951936  ;;  %p14_p3 = scmp.ge.s32.totalorder %s1060_s12, 7   ;;  %s1457_s6 = smov %s1009_s7 }
  0xc7   : > { %s1458_s7 = smov %s1013_s8  ;;  %s1459_s8 = smov %s1072_s15 }
  0xc8   : > { %s1460_s9 = smov %s1060_s12  ;;  %16 = sbr.rel (!%p14_p3) target bundleno = 5 (0x5), region = 69 }
  0xcf   :  { %798 = vsyncpa [#allocation3], 1 }
  0xd0   :  { %800 = vsyncpa [#allocation3 + $0x1], 1 }
  0xd1   :  { %801 = vsyncpa [#allocation4], 1 }
  0xd2   :  { %803 = vsyncpa [#allocation4 + $0x1], 1 }

</bundles_post_ra>
